<compile_context>
chip_gen: v7x
topology: tpu7x:2x2x1
jax: 0.10.0
libtpu: 0.0.40
codegen_flags: <defaults>
</compile_context>

<pallas_src>
import functools
import math

import jax
import jax.numpy as jnp
from jax import lax
from jax.experimental import pallas as pl
from jax.experimental.pallas import tpu as pltpu


def _round_up(x, m):
    return (x + m - 1) // m * m


def _pick_vmem_limit_bytes():
    # ~96 MiB on v5e/v6e (128 MiB physical VMEM), ~48 MiB on v7x (64 MiB/TC).
    try:
        cap = int(pltpu.get_tpu_info().vmem_capacity_bytes)
    except Exception:  # conservative fallback if the query is unavailable
        cap = 64 * 1024 * 1024
    return min(cap * 3 // 4, 96 * 1024 * 1024)


# ----------------------------------------------------------------------------
# Fused kernel: image proj (tiled K-reduction) + text pool/proj + L2-norm + sim
# ----------------------------------------------------------------------------
def _clip_forward_kernel(x_img_ref, wi_ref, bi_ref, tok_ref, wt_ref, bt_ref,
                         img_out_ref, txt_out_ref, sim_ref,
                         acc_ref, txt_ref):
    k = pl.program_id(1)

    @pl.when(k == 0)
    def _init():
        acc_ref[...] = jnp.zeros_like(acc_ref)
        # Text branch hoisted off the critical tail: its XLU pooling, MXU
        # matmul and EUP rsqrt hide under the streamed Wi DMAs.
        tok = tok_ref[...].astype(jnp.float32)                   # (Bt, L, E)
        pooled = jnp.sum(tok, axis=1) * (1.0 / tok.shape[1])     # (Bt, E) f32
        txt = jnp.dot(pooled.astype(jnp.bfloat16), wt_ref[...],
                      preferred_element_type=jnp.float32) + bt_ref[...]
        # L2 norm as rsqrt * x (EUP).  NOTE: no epsilon, matching torch
        # `x / x.norm(dim=1, keepdim=True)`.
        txt_ref[...] = txt * lax.rsqrt(jnp.sum(txt * txt, axis=1,
                                               keepdims=True))

    # Image projection: stream (bm, tk) x (tk, D) bf16 tiles through the MXU,
    # accumulate in an f32 VMEM scratch.  Zero-padded K remainder is exact.
    acc_ref[...] += jnp.dot(x_img_ref[...], wi_ref[...],
                            preferred_element_type=jnp.float32)

    @pl.when(k == pl.num_programs(1) - 1)
    def _finalize():
        img = acc_ref[...] + bi_ref[...]                          # (bm, D) f32
        img_n = img * lax.rsqrt(jnp.sum(img * img, axis=1, keepdims=True))
        txt_n = txt_ref[...]

        img_out_ref[...] = img_n
        txt_out_ref[...] = txt_n
        # similarity = img_n @ txt_n.T  (f32, matching torch .float() matmul)
        sim_ref[...] = lax.dot_general(
            img_n, txt_n, (((1,), (1,)), ((), ())),
            preferred_element_type=jnp.float32)


# ----------------------------------------------------------------------------
# Wrapper reproducing CLIPFineTuner.forward(image_batch, caption_batch)
# (fusion/classifier heads from __init__ are intentionally absent: unused.)
# ----------------------------------------------------------------------------
@functools.partial(jax.jit, static_argnames=("tk",))
def clip_finetuner_forward(image_batch, token_embeddings, Wi, bi, Wt, bt, *,
                           tk=2048):
    B = image_batch.shape[0]
    Kimg = math.prod(image_batch.shape[1:])
    Kin, D = Wi.shape
    assert Kin == Kimg
    Bt, L, E = token_embeddings.shape

    # --- tiling: large K tiles (multiple of 256), zero-padded remainder ------
    tk = max(256, _round_up(int(tk), 256))
    tk_eff = min(tk, _round_up(Kimg, 256))
    Kpad = _round_up(Kimg, tk_eff)
    n_k = Kpad // tk_eff

    # --- M blocks over image rows: bf16 sublane pack (16) up to 128 rows -----
    bm = min(128, _round_up(B, 16))
    Bpad = _round_up(B, bm)
    n_m = Bpad // bm

    # Streamed MXU operands in bf16 (half the HBM DMA bytes); elementwise math
    # stays f32 inside the kernel.  Zero padding keeps the matmul exact.
    x_img = image_batch.reshape(B, Kimg).astype(jnp.bfloat16)
    x_img = jnp.pad(x_img, ((0, Bpad - B), (0, Kpad - Kimg)))
    wi = jnp.pad(Wi.astype(jnp.bfloat16), ((0, Kpad - Kimg), (0, 0)))
    wt = Wt.astype(jnp.bfloat16)
    bi2 = bi.reshape(1, D).astype(jnp.float32)
    bt2 = bt.reshape(1, D).astype(jnp.float32)
    tok = token_embeddings.astype(jnp.bfloat16)   # upcast to f32 in-kernel

    grid_spec = pltpu.PrefetchScalarGridSpec(
        num_scalar_prefetch=0,
        grid=(n_m, n_k),
        in_specs=[
            # streamed over the K-reduction, explicitly double-buffered
            # (bump to pl.Buffered(3) on v6e if the trace shows exposed DMA)
            pl.BlockSpec((bm, tk_eff), lambda m, k: (m, k),
                         pipeline_mode=pl.Buffered(2)),
            pl.BlockSpec((tk_eff, D), lambda m, k: (k, 0),
                         pipeline_mode=pl.Buffered(2)),
            # small resident operands: constant index -> single-buffered
            pl.BlockSpec((1, D), lambda m, k: (0, 0),
                         pipeline_mode=pl.Buffered(1)),
            pl.BlockSpec((Bt, L, E), lambda m, k: (0, 0, 0),
                         pipeline_mode=pl.Buffered(1)),
            pl.BlockSpec((E, D), lambda m, k: (0, 0),
                         pipeline_mode=pl.Buffered(1)),
            pl.BlockSpec((1, D), lambda m, k: (0, 0),
                         pipeline_mode=pl.Buffered(1)),
        ],
        out_specs=(
            pl.BlockSpec((bm, D), lambda m, k: (m, 0)),
            pl.BlockSpec((Bt, D), lambda m, k: (0, 0)),
            pl.BlockSpec((bm, Bt), lambda m, k: (m, 0)),
        ),
        scratch_shapes=[
            pltpu.VMEM((bm, D), jnp.float32),    # image-proj accumulator
            pltpu.VMEM((Bt, D), jnp.float32),    # normalized text features
        ],
    )

    img_n, txt_n, sim = pl.pallas_call(
        _clip_forward_kernel,
        out_shape=(
            jax.ShapeDtypeStruct((Bpad, D), jnp.float32),
            jax.ShapeDtypeStruct((Bt, D), jnp.float32),
            jax.ShapeDtypeStruct((Bpad, Bt), jnp.float32),
        ),
        grid_spec=grid_spec,
        compiler_params=pltpu.CompilerParams(
            # M axis is independent -> "parallel" (v7x megacore sharding);
            # K-reduction must stay innermost and "arbitrary".
            dimension_semantics=("parallel", "arbitrary"),
            vmem_limit_bytes=_pick_vmem_limit_bytes(),
        ),
    )(x_img, wi, bi2, tok, wt, bt2)

    return {"image_features": img_n[:B],
            "text_features": txt_n,
            "similarity": sim[:B]}


if __name__ == "__main__":
    key = jax.random.PRNGKey(0)

    # Small but TPU-friendly shapes: B=16 fills a packed bf16 [16,128] vreg,
    # D=128 makes feature stores lane-dense.  Real CLIP ViT-B/32 would use
    # D=512, Kimg=3*224*224=150528 (handled by the padded K tiling).
    B, C, H, W = 16, 3, 16, 16     # flattened image dim Kimg = 768
    D = 128                        # stand-in embedding dim (multiple of 128)
    L, E = 8, 128                  # caption tokens / token-embedding width

    ks = iter(jax.random.split(key, 8))
    image_batch = jax.random.normal(next(ks), (B, C, H, W), jnp.float32)
    token_embeddings = jax.random.normal(next(ks), (B, L, E), jnp.float32)

    # Frozen CLIP stand-in encoder weights.
    # TODO(synk): real CLIP ViT-B/32 image/text transformers are replaced by
    # deterministic linear projections (no checkpoint available in-script).
    Wi = jax.random.normal(next(ks), (C * H * W, D), jnp.float32) * 0.02
    bi = jnp.zeros((D,), jnp.float32)
    Wt = jax.random.normal(next(ks), (E, D), jnp.float32) * 0.02
    bt = jnp.zeros((D,), jnp.float32)

    out = clip_finetuner_forward(image_batch, token_embeddings, Wi, bi, Wt, bt)
    out = jax.block_until_ready(out)

    # ---- pure-JAX reference with identical bf16-in / f32-accumulate numerics
    x_img = image_batch.reshape(B, -1).astype(jnp.bfloat16)
    img_ref = jnp.dot(x_img, Wi.astype(jnp.bfloat16),
                      preferred_element_type=jnp.float32) + bi
    pooled = token_embeddings.astype(jnp.bfloat16).astype(jnp.float32).mean(1)
    txt_ref = jnp.dot(pooled.astype(jnp.bfloat16), Wt.astype(jnp.bfloat16),
                      preferred_element_type=jnp.float32) + bt
    img_n_ref = img_ref / jnp.linalg.norm(img_ref, axis=1, keepdims=True)
    txt_n_ref = txt_ref / jnp.linalg.norm(txt_ref, axis=1, keepdims=True)
    sim_ref = img_n_ref @ txt_n_ref.T

    assert out["image_features"].shape == (B, D)
    assert out["text_features"].shape == (B, D)
    assert out["similarity"].shape == (B, B)
    assert jnp.allclose(jnp.linalg.norm(out["image_features"], axis=1), 1.0,
                        atol=1e-4)
    assert jnp.allclose(jnp.linalg.norm(out["text_features"], axis=1), 1.0,
                        atol=1e-4)
    assert jnp.allclose(out["image_features"], img_n_ref, atol=5e-3, rtol=5e-3)
    assert jnp.allclose(out["text_features"], txt_n_ref, atol=5e-3, rtol=5e-3)
    assert jnp.allclose(out["similarity"], sim_ref, atol=5e-3, rtol=5e-3)

    print("KERNEL_OK")
</pallas_src>

<mosaic_0001>
module attributes {stable_mosaic.version = 11 : i64} {
  func.func @_clip_forward_kernel(%arg0: i32, %arg1: i32, %arg2: memref<16x768xbf16, #tpu.memory_space<vmem>>, %arg3: memref<768x128xbf16, #tpu.memory_space<vmem>>, %arg4: memref<1x128xf32, #tpu.memory_space<vmem>>, %arg5: memref<16x8x128xbf16, #tpu.memory_space<vmem>>, %arg6: memref<128x128xbf16, #tpu.memory_space<vmem>>, %arg7: memref<1x128xf32, #tpu.memory_space<vmem>>, %arg8: memref<16x128xf32, #tpu.memory_space<vmem>>, %arg9: memref<16x128xf32, #tpu.memory_space<vmem>>, %arg10: memref<16x16xf32, #tpu.memory_space<vmem>>, %arg11: memref<16x128xf32, #tpu.memory_space<vmem>>, %arg12: memref<16x128xf32, #tpu.memory_space<vmem>>) attributes {dimension_semantics = [#tpu.dimension_semantics<parallel>, #tpu.dimension_semantics<arbitrary>], iteration_bounds = array<i64: 1, 1>, scalar_prefetch = 0 : i64, scratch_operands = 2 : i64, tpu.core_type = #tpu.core_type<tc>, window_params = [{pipeline_mode = #tpu.pipeline_mode<double_buffered>, transform_indices = @transform_0, window_bounds = array<i64: 16, 768>}, {pipeline_mode = #tpu.pipeline_mode<double_buffered>, transform_indices = @transform_1, window_bounds = array<i64: 768, 128>}, {pipeline_mode = #tpu.pipeline_mode<synchronous>, transform_indices = @transform_2, window_bounds = array<i64: 1, 128>}, {pipeline_mode = #tpu.pipeline_mode<synchronous>, transform_indices = @transform_3, window_bounds = array<i64: 16, 8, 128>}, {pipeline_mode = #tpu.pipeline_mode<synchronous>, transform_indices = @transform_4, window_bounds = array<i64: 128, 128>}, {pipeline_mode = #tpu.pipeline_mode<synchronous>, transform_indices = @transform_5, window_bounds = array<i64: 1, 128>}, {transform_indices = @transform_6, window_bounds = array<i64: 16, 128>}, {pipeline_mode = #tpu.pipeline_mode<synchronous>, transform_indices = @transform_7, window_bounds = array<i64: 16, 128>}, {transform_indices = @transform_8, window_bounds = array<i64: 16, 16>}]} {
    %c0_i32 = arith.constant 0 : i32
    %0 = arith.cmpi eq, %arg1, %c0_i32 : i32
    %1 = arith.extui %0 : i1 to i32
    %c0_i32_0 = arith.constant 0 : i32
    %2 = arith.cmpi ne, %1, %c0_i32_0 : i32
    scf.if %2 {
      %cst_10 = arith.constant 0.000000e+00 : f32
      %12 = vector.broadcast %cst_10 : f32 to vector<16x128xf32>
      %c0_11 = arith.constant 0 : index
      %c0_12 = arith.constant 0 : index
      %13 = vector.load %arg11[%c0_11, %c0_12] : memref<16x128xf32, #tpu.memory_space<vmem>>, vector<16x128xf32>
      tpu.vector_store %arg11[%c0_11, %c0_12], %12 {strides = array<i32>} : memref<16x128xf32, #tpu.memory_space<vmem>>, vector<16x128xf32>,
      %c0_13 = arith.constant 0 : index
      %c0_14 = arith.constant 0 : index
      %c0_15 = arith.constant 0 : index
      %14 = vector.load %arg5[%c0_13, %c0_14, %c0_15] : memref<16x8x128xbf16, #tpu.memory_space<vmem>>, vector<16x8x128xbf16>
      %15 = arith.extf %14 : vector<16x8x128xbf16> to vector<16x8x128xf32>
      %cst_16 = arith.constant dense<0.000000e+00> : vector<16x128xf32>
      %16 = vector.multi_reduction <add>, %15, %cst_16 [1] : vector<16x8x128xf32> to vector<16x128xf32>
      %cst_17 = arith.constant 1.250000e-01 : f32
      %17 = vector.broadcast %cst_17 : f32 to vector<16x128xf32>
      %18 = arith.mulf %16, %17 : vector<16x128xf32>
      %19 = arith.truncf %18 : vector<16x128xf32> to vector<16x128xbf16>
      %c0_18 = arith.constant 0 : index
      %c0_19 = arith.constant 0 : index
      %20 = vector.load %arg6[%c0_18, %c0_19] : memref<128x128xbf16, #tpu.memory_space<vmem>>, vector<128x128xbf16>
      %cst_20 = arith.constant dense<0.000000e+00> : vector<16x128xf32>
      %21 = tpu.matmul %19, %20, %cst_20 {dimension_numbers = #tpu.dot_dimension_numbers<[1], [0], [0], [1], [0, 0, 1, 1], [], []>} : vector<16x128xbf16>, vector<128x128xbf16>, vector<16x128xf32> -> vector<16x128xf32>
      %c0_21 = arith.constant 0 : index
      %c0_22 = arith.constant 0 : index
      %22 = vector.load %arg7[%c0_21, %c0_22] : memref<1x128xf32, #tpu.memory_space<vmem>>, vector<1x128xf32>
      %23 = vector.broadcast %22 : vector<1x128xf32> to vector<16x128xf32>
      %24 = arith.addf %21, %23 : vector<16x128xf32>
      %25 = arith.mulf %24, %24 : vector<16x128xf32>
      %cst_23 = arith.constant dense<0.000000e+00> : vector<16xf32>
      %26 = vector.multi_reduction <add>, %25, %cst_23 [1] : vector<16x128xf32> to vector<16xf32>
      %27 = vector.shape_cast %26 : vector<16xf32> to vector<16x1xf32>
      %28 = math.rsqrt %27 : vector<16x1xf32>
      %29 = vector.broadcast %28 : vector<16x1xf32> to vector<16x128xf32>
      %30 = arith.mulf %24, %29 : vector<16x128xf32>
      %c0_24 = arith.constant 0 : index
      %c0_25 = arith.constant 0 : index
      %31 = vector.load %arg12[%c0_24, %c0_25] : memref<16x128xf32, #tpu.memory_space<vmem>>, vector<16x128xf32>
      tpu.vector_store %arg12[%c0_24, %c0_25], %30 {strides = array<i32>} : memref<16x128xf32, #tpu.memory_space<vmem>>, vector<16x128xf32>,
    } else {
    }
    %c0 = arith.constant 0 : index
    %c0_1 = arith.constant 0 : index
    %3 = vector.load %arg11[%c0, %c0_1] : memref<16x128xf32, #tpu.memory_space<vmem>>, vector<16x128xf32>
    %c0_2 = arith.constant 0 : index
    %c0_3 = arith.constant 0 : index
    %4 = vector.load %arg2[%c0_2, %c0_3] : memref<16x768xbf16, #tpu.memory_space<vmem>>, vector<16x768xbf16>
    %c0_4 = arith.constant 0 : index
    %c0_5 = arith.constant 0 : index
    %5 = vector.load %arg3[%c0_4, %c0_5] : memref<768x128xbf16, #tpu.memory_space<vmem>>, vector<768x128xbf16>
    %cst = arith.constant dense<0.000000e+00> : vector<16x128xf32>
    %6 = tpu.matmul %4, %5, %cst {dimension_numbers = #tpu.dot_dimension_numbers<[1], [0], [0], [1], [0, 0, 1, 1], [], []>} : vector<16x768xbf16>, vector<768x128xbf16>, vector<16x128xf32> -> vector<16x128xf32>
    %7 = arith.addf %3, %6 : vector<16x128xf32>
    %c0_6 = arith.constant 0 : index
    %c0_7 = arith.constant 0 : index
    %8 = vector.load %arg11[%c0_6, %c0_7] : memref<16x128xf32, #tpu.memory_space<vmem>>, vector<16x128xf32>
    tpu.vector_store %arg11[%c0_6, %c0_7], %7 {strides = array<i32>} : memref<16x128xf32, #tpu.memory_space<vmem>>, vector<16x128xf32>,
    %c0_i32_8 = arith.constant 0 : i32
    %9 = arith.cmpi eq, %arg1, %c0_i32_8 : i32
    %10 = arith.extui %9 : i1 to i32
    %c0_i32_9 = arith.constant 0 : i32
    %11 = arith.cmpi ne, %10, %c0_i32_9 : i32
    scf.if %11 {
      %c0_10 = arith.constant 0 : index
      %c0_11 = arith.constant 0 : index
      %12 = vector.load %arg11[%c0_10, %c0_11] : memref<16x128xf32, #tpu.memory_space<vmem>>, vector<16x128xf32>
      %c0_12 = arith.constant 0 : index
      %c0_13 = arith.constant 0 : index
      %13 = vector.load %arg4[%c0_12, %c0_13] : memref<1x128xf32, #tpu.memory_space<vmem>>, vector<1x128xf32>
      %14 = vector.broadcast %13 : vector<1x128xf32> to vector<16x128xf32>
      %15 = arith.addf %12, %14 : vector<16x128xf32>
      %16 = arith.mulf %15, %15 : vector<16x128xf32>
      %cst_14 = arith.constant dense<0.000000e+00> : vector<16xf32>
      %17 = vector.multi_reduction <add>, %16, %cst_14 [1] : vector<16x128xf32> to vector<16xf32>
      %18 = vector.shape_cast %17 : vector<16xf32> to vector<16x1xf32>
      %19 = math.rsqrt %18 : vector<16x1xf32>
      %20 = vector.broadcast %19 : vector<16x1xf32> to vector<16x128xf32>
      %21 = arith.mulf %15, %20 : vector<16x128xf32>
      %c0_15 = arith.constant 0 : index
      %c0_16 = arith.constant 0 : index
      %22 = vector.load %arg12[%c0_15, %c0_16] : memref<16x128xf32, #tpu.memory_space<vmem>>, vector<16x128xf32>
      %c0_17 = arith.constant 0 : index
      %c0_18 = arith.constant 0 : index
      %23 = vector.load %arg8[%c0_17, %c0_18] : memref<16x128xf32, #tpu.memory_space<vmem>>, vector<16x128xf32>
      tpu.vector_store %arg8[%c0_17, %c0_18], %21 {strides = array<i32>} : memref<16x128xf32, #tpu.memory_space<vmem>>, vector<16x128xf32>,
      %c0_19 = arith.constant 0 : index
      %c0_20 = arith.constant 0 : index
      %24 = vector.load %arg9[%c0_19, %c0_20] : memref<16x128xf32, #tpu.memory_space<vmem>>, vector<16x128xf32>
      tpu.vector_store %arg9[%c0_19, %c0_20], %22 {strides = array<i32>} : memref<16x128xf32, #tpu.memory_space<vmem>>, vector<16x128xf32>,
      %cst_21 = arith.constant dense<0.000000e+00> : vector<16x16xf32>
      %25 = tpu.matmul %21, %22, %cst_21 {dimension_numbers = #tpu.dot_dimension_numbers<[1], [1], [0], [0], [0, 0, 1, 0], [], []>} : vector<16x128xf32>, vector<16x128xf32>, vector<16x16xf32> -> vector<16x16xf32>
      %c0_22 = arith.constant 0 : index
      %c0_23 = arith.constant 0 : index
      %26 = vector.load %arg10[%c0_22, %c0_23] : memref<16x16xf32, #tpu.memory_space<vmem>>, vector<16x16xf32>
      tpu.vector_store %arg10[%c0_22, %c0_23], %25 {strides = array<i32>} : memref<16x16xf32, #tpu.memory_space<vmem>>, vector<16x16xf32>,
    } else {
    }
    return
  }
  func.func @transform_0(%arg0: i32, %arg1: i32) -> (i32, i32) {
    %c0_i32 = arith.constant 0 : i32
    return %arg0, %arg1 : i32, i32
  }
  func.func @transform_1(%arg0: i32, %arg1: i32) -> (i32, i32) {
    %c0_i32 = arith.constant 0 : i32
    %c0_i32_0 = arith.constant 0 : i32
    return %arg1, %c0_i32 : i32, i32
  }
  func.func @transform_2(%arg0: i32, %arg1: i32) -> (i32, i32) {
    %c0_i32 = arith.constant 0 : i32
    %c0_i32_0 = arith.constant 0 : i32
    %c0_i32_1 = arith.constant 0 : i32
    return %c0_i32, %c0_i32_0 : i32, i32
  }
  func.func @transform_3(%arg0: i32, %arg1: i32) -> (i32, i32, i32) {
    %c0_i32 = arith.constant 0 : i32
    %c0_i32_0 = arith.constant 0 : i32
    %c0_i32_1 = arith.constant 0 : i32
    %c0_i32_2 = arith.constant 0 : i32
    return %c0_i32, %c0_i32_0, %c0_i32_1 : i32, i32, i32
  }
  func.func @transform_4(%arg0: i32, %arg1: i32) -> (i32, i32) {
    %c0_i32 = arith.constant 0 : i32
    %c0_i32_0 = arith.constant 0 : i32
    %c0_i32_1 = arith.constant 0 : i32
    return %c0_i32, %c0_i32_0 : i32, i32
  }
  func.func @transform_5(%arg0: i32, %arg1: i32) -> (i32, i32) {
    %c0_i32 = arith.constant 0 : i32
    %c0_i32_0 = arith.constant 0 : i32
    %c0_i32_1 = arith.constant 0 : i32
    return %c0_i32, %c0_i32_0 : i32, i32
  }
  func.func @transform_6(%arg0: i32, %arg1: i32) -> (i32, i32) {
    %c0_i32 = arith.constant 0 : i32
    %c0_i32_0 = arith.constant 0 : i32
    return %arg0, %c0_i32 : i32, i32
  }
  func.func @transform_7(%arg0: i32, %arg1: i32) -> (i32, i32) {
    %c0_i32 = arith.constant 0 : i32
    %c0_i32_0 = arith.constant 0 : i32
    %c0_i32_1 = arith.constant 0 : i32
    return %c0_i32, %c0_i32_0 : i32, i32
  }
  func.func @transform_8(%arg0: i32, %arg1: i32) -> (i32, i32) {
    %c0_i32 = arith.constant 0 : i32
    %c0_i32_0 = arith.constant 0 : i32
    return %arg0, %c0_i32 : i32, i32
  }
}

</mosaic_0001>

<bundles_post_ra>
// kernel: clip_finetuner_forward.1
= control target key start
LH: loop header
LB: loop body
LE: loop exit
PB: predicated region body
PF: predicated region fallthrough
CT: control target
= control target key end

     0   :  { %14 = vsyncpa [#allocation5], 0  ;;  %v1441_v1 = vmov 0.0   ;;  %vm1442_vm0 = vmmov 0   ;;  %vm250_vm1 = vcmask 1041409   ;;  %vm252_vm2 = vcmask 1042434   ;;  %s1850_s0 = inlined_call_operand.vmem [shape: bf16[16,768], index: 0, kind: input, shape index: {}]   ;;  %s1851_s1 = inlined_call_operand.vmem [shape: bf16[768,128], index: 1, kind: input, shape index: {}]   ;;  %s1852_s2 = inlined_call_operand.vmem [shape: f32[1,128], index: 2, kind: input, shape index: {}]   ;;  %s1853_s3 = inlined_call_operand.vmem [shape: bf16[16,8,128], index: 3, kind: input, shape index: {}]   ;;  %s1854_s4 = inlined_call_operand.vmem [shape: bf16[128,128], index: 4, kind: input, shape index: {}]   ;;  %s1855_s5 = inlined_call_operand.vmem [shape: f32[1,128], index: 5, kind: input, shape index: {}]   ;;  %s1856_s6 = inlined_call_operand.hbm [shape: f32[16,128], index: 6, kind: output, shape index: {0}]   ;;  %s1857_s7 = inlined_call_operand.hbm [shape: f32[16,128], index: 7, kind: output, shape index: {1}]   ;;  %s1858_s8 = inlined_call_operand.hbm [shape: f32[16,16], index: 8, kind: output, shape index: {2}]  }
   0x1   :  { %v1298_v0 = vld [vmem:[%s1854_s4] sm:$0xff]   ;;  %1260 = vmatprep.subr.bf16.mxu0 %v1441_v1  ;;  %1276 = vmatprep.mubr.msk.bf16.mxu0 %vm1442_vm0, %v1441_v1  ;;  %v1301_v4 = vld [vmem:[%s1854_s4 + $0x8] sm:$0xff]   ;;  %v1304_v7 = vld [vmem:[%s1854_s4 + $0x10] sm:$0xff]   ;;  %vm254_vm3 = vcmask 1043459   ;;  %vm256_vm4 = vcmask 1044484   ;;  %vm258_vm5 = vcmask 1045509  }
   0x2   :  { %v1299_v2 = vld [vmem:[%s1851_s1 + $0x40] sm:$0xff]   ;;  %1261 = vmatpush3.bf16.msra.mxu0 %v1298_v0  ;;  %v1302_v5 = vld [vmem:[%s1851_s1 + $0x48] sm:$0xff]   ;;  %v1305_v8 = vld [vmem:[%s1851_s1 + $0x50] sm:$0xff]   ;;  %vm260_vm6 = vcmask 1046534   ;;  %vm262_vm7 = vcmask 1047559  }
   0x3   :  { %v1300_v3 = vld [vmem:[%s1851_s1] sm:$0xff]   ;;  %1190 = vmatprep.subr.bf16.mxu1 %v1299_v2  ;;  %1262 = vmatprep.subr.bf16.mxu0 %v1441_v1  ;;  %v1303_v6 = vld [vmem:[%s1851_s1 + $0x8] sm:$0xff]   ;;  %v1306_v9 = vld [vmem:[%s1851_s1 + $0x10] sm:$0xff]  }
   0x4   :  { %1191 = vmatpush3.bf16.msra.mxu1 %v1300_v3  ;;  %v1307_v10 = vld [vmem:[%s1854_s4 + $0x18] sm:$0xff]   ;;  %v1311_v13 = vld [vmem:[%s1851_s1 + $0x60] sm:$0xff]   ;;  %v1314_v16 = vld [vmem:[%s1851_s1 + $0x68] sm:$0xff]  }
   0x5   :  { %1192 = vmatprep.subr.bf16.mxu1 %v1302_v5  ;;  %v1308_v11 = vld [vmem:[%s1851_s1 + $0x58] sm:$0xff]   ;;  %v1310_v14 = vld [vmem:[%s1854_s4 + $0x20] sm:$0xff]   ;;  %v1313_v17 = vld [vmem:[%s1854_s4 + $0x28] sm:$0xff]  }
   0x6   :  { %1263 = vmatpush3.bf16.msra.mxu0 %v1301_v4  ;;  %v1309_v12 = vld [vmem:[%s1851_s1 + $0x18] sm:$0xff]   ;;  %v1312_v15 = vld [vmem:[%s1851_s1 + $0x20] sm:$0xff]   ;;  %v1315_v18 = vld [vmem:[%s1851_s1 + $0x28] sm:$0xff]  }
   0x7   :  { %1264 = vmatprep.subr.bf16.mxu0 %v1441_v1  ;;  %v1316_v19 = vld [vmem:[%s1854_s4 + $0x30] sm:$0xff]   ;;  %v1320_v22 = vld [vmem:[%s1851_s1 + $0x78] sm:$0xff]   ;;  %v1143_v24 = vld [vmem:[%s1853_s3] sm:$0xff]  }
   0x8   :  { %1193 = vmatpush3.bf16.msra.mxu1 %v1303_v6  ;;  %v1317_v20 = vld [vmem:[%s1851_s1 + $0x70] sm:$0xff]   ;;  %v1319_v23 = vld [vmem:[%s1854_s4 + $0x38] sm:$0xff]   ;;  %v1174_v25 = vld [vmem:[%s1853_s3 + $0x8] sm:$0xff]   ;;  %v1144_v27 = vunpack.c.l.bf16 %v1143_v24  ;;  %v1145_v28 = vunpack.c.h.bf16 %v1143_v24 }
   0x9   :  { %1194 = vmatprep.subr.bf16.mxu1 %v1305_v8  ;;  %v1318_v21 = vld [vmem:[%s1851_s1 + $0x30] sm:$0xff]   ;;  %v1148_v29 = vunpack.c.l.bf16 %v1174_v25  ;;  %v1149_v30 = vunpack.c.h.bf16 %v1174_v25  ;;  %v1176_v31 = vld [vmem:[%s1853_s3 + $0x18] sm:$0xff]   ;;  %v1585_v32 = vld [vmem:[%s1853_s3 + $0x20] sm:$0xff]  }
   0xa   :  { %1265 = vmatpush3.bf16.msra.mxu0 %v1304_v7  ;;  %v1175_v26 = vld [vmem:[%s1853_s3 + $0x10] sm:$0xff]   ;;  %v1590_v33 = vld [vmem:[%s1853_s3 + $0x28] sm:$0xff]   ;;  %v1156_v36 = vunpack.c.l.bf16 %v1176_v31  ;;  %v1157_v37 = vunpack.c.h.bf16 %v1176_v31  ;;  %v1600_v39 = vld [vmem:[%s1853_s3 + $0x38] sm:$0xff]   ;;  %v1160_v41 = vunpack.c.l.bf16 %v1585_v32  ;;  %v1161_v42 = vunpack.c.h.bf16 %v1585_v32 }
   0xb   :  { %1266 = vmatprep.subr.bf16.mxu0 %v1441_v1  ;;  %v1152_v34 = vunpack.c.l.bf16 %v1175_v26  ;;  %v1153_v35 = vunpack.c.h.bf16 %v1175_v26  ;;  %v1595_v38 = vld [vmem:[%s1853_s3 + $0x30] sm:$0xff]   ;;  %v1321_v40 = vld [vmem:[%s1851_s1 + $0x38] sm:$0xff]   ;;  %v1164_v43 = vunpack.c.l.bf16 %v1590_v33  ;;  %v1165_v44 = vunpack.c.h.bf16 %v1590_v33  ;;  %v1325_v50 = vld [vmem:[%s1851_s1 + $0xc0] sm:$0xff]  }
   0xc   :  { %1195 = vmatpush3.bf16.msra.mxu1 %v1306_v9  ;;  %v1324_v45 = vld [vmem:[%s1850_s0 + $0x4] ss:$24 sps:$4 sm:$0xff]   ;;  %v1168_v46 = vunpack.c.l.bf16 %v1595_v38  ;;  %v1169_v47 = vunpack.c.h.bf16 %v1595_v38  ;;  %v1172_v48 = vunpack.c.l.bf16 %v1600_v39  ;;  %v1173_v49 = vunpack.c.h.bf16 %v1600_v39  ;;  %v1322_v63 = vld [vmem:[%s1850_s0] ss:$24 sps:$4 sm:$0xff]   ;;  %v1331_v26 = vld [vmem:[%s1851_s1 + $0x148] sm:$0xff]  }
   0xd   :  { %1196 = vmatprep.subr.bf16.mxu1 %v1308_v11  ;;  %v67_v51 = vrot.slane %v1144_v27, 4  ;;  %v73_v52 = vrot.slane %v1145_v28, 4  ;;  %v79_v53 = vrot.slane %v1148_v29, 4  ;;  %v85_v54 = vrot.slane %v1149_v30, 4  ;;  %828 = vmatprep.mubr.bf16.mxu1 %v1324_v45  ;;  %v1327_v4 = vld [vmem:[%s1851_s1 + $0x140] sm:$0xff]  }
   0xe   :  { %1267 = vmatpush3.bf16.msra.mxu0 %v1307_v10  ;;  %v91_v55 = vrot.slane %v1152_v34, 4  ;;  %v97_v56 = vrot.slane %v1153_v35, 4  ;;  %v103_v57 = vrot.slane %v1156_v36, 4  ;;  %v109_v58 = vrot.slane %v1157_v37, 4  ;;  %v1328_v9 = vld [vmem:[%s1851_s1 + $0x100] sm:$0xff]  }
   0xf   :  { %1268 = vmatprep.subr.bf16.mxu0 %v1441_v1  ;;  %v68_v59 = vadd.f32 %v1144_v27, %v67_v51  ;;  %v74_v60 = vadd.f32 %v1145_v28, %v73_v52  ;;  %v80_v61 = vadd.f32 %v1148_v29, %v79_v53  ;;  %v86_v62 = vadd.f32 %v1149_v30, %v85_v54  ;;  %v1332_v27 = vld [vmem:[%s1851_s1 + $0x108] sm:$0xff]   ;;  %v1335_v52 = vld [vmem:[%s1851_s1 + $0x150] sm:$0xff]  }
  0x10   :  { %1197 = vmatpush3.bf16.msra.mxu1 %v1309_v12  ;;  %v92_v0 = vadd.f32 %v1152_v34, %v91_v55  ;;  %v104_v2 = vadd.f32 %v1156_v36, %v103_v57  ;;  %v110_v3 = vadd.f32 %v1157_v37, %v109_v58  ;;  %v121_v45 = vrot.slane %v1161_v42, 4 }
  0x11   :  { %1198 = vmatprep.subr.bf16.mxu1 %v1311_v13  ;;  %v69_v5 = vrot.slane %v68_v59, 2  ;;  %v75_v6 = vrot.slane %v74_v60, 2  ;;  %v81_v7 = vrot.slane %v80_v61, 2  ;;  %v87_v8 = vrot.slane %v86_v62, 2 }
  0x12   :  { %1269 = vmatpush3.bf16.msra.mxu0 %v1310_v14  ;;  %v93_v10 = vrot.slane %v92_v0, 2  ;;  %v105_v12 = vrot.slane %v104_v2, 2  ;;  %v111_v13 = vrot.slane %v110_v3, 2  ;;  %v133_v51 = vrot.slane %v1165_v44, 4 }
  0x13   :  { %1270 = vmatprep.subr.bf16.mxu0 %v1441_v1  ;;  %v70_v14 = vadd.f32 %v69_v5, %v68_v59  ;;  %v139_v53 = vrot.slane %v1168_v46, 4  ;;  %v145_v54 = vrot.slane %v1169_v47, 4  ;;  %v151_v55 = vrot.slane %v1172_v48, 4 }
  0x14   :  { %1199 = vmatpush3.bf16.msra.mxu1 %v1312_v15  ;;  %v76_v15 = vadd.f32 %v75_v6, %v74_v60  ;;  %v122_v58 = vadd.f32 %v1161_v42, %v121_v45  ;;  %v134_v60 = vadd.f32 %v1165_v44, %v133_v51  ;;  %v1339_v6 = vld [vmem:[%s1851_s1 + $0x158] sm:$0xff]  }
  0x15   :  { %1200 = vmatprep.subr.bf16.mxu1 %v1314_v16  ;;  %v82_v16 = vadd.f32 %v81_v7, %v80_v61  ;;  %v140_v61 = vadd.f32 %v1168_v46, %v139_v53 }
  0x16   :  { %1271 = vmatpush3.bf16.msra.mxu0 %v1313_v17  ;;  %v88_v17 = vadd.f32 %v87_v8, %v86_v62  ;;  %v146_v62 = vadd.f32 %v1169_v47, %v145_v54  ;;  %v123_v33 = vrot.slane %v122_v58, 2  ;;  %v135_v44 = vrot.slane %v134_v60, 2 }
  0x17   :  { %1272 = vmatprep.subr.bf16.mxu0 %v1441_v1  ;;  %v83_v24 = vrot.slane %v82_v16, 1 }
  0x18   :  { %1201 = vmatpush3.bf16.msra.mxu1 %v1315_v18  ;;  %v1629_v18 = vadd.f32 %v93_v10, %v92_v0  ;;  %v89_v25 = vrot.slane %v88_v17, 1  ;;  %v141_v0 = vrot.slane %v140_v61, 2  ;;  %v124_v47 = vadd.f32 %v123_v33, %v122_v58 }
  0x19   :  { %1202 = vmatprep.subr.bf16.mxu1 %v1317_v20  ;;  %v1633_v20 = vadd.f32 %v105_v12, %v104_v2  ;;  %v1649_v36 = vadd.f32 %v83_v24, %v82_v16 }
  0x1a   :  { %1273 = vmatpush3.bf16.msra.mxu0 %v1316_v19  ;;  %v95_v28 = vrot.slane %v1629_v18, 1  ;;  %v1651_v37 = vadd.f32 %v89_v25, %v88_v17  ;;  %v125_v8 = vrot.slane %v124_v47, 1 }
  0x1b   :  { %1274 = vmatprep.subr.bf16.mxu0 %v1441_v1  ;;  %v98_v1 = vadd.f32 %v1153_v35, %v97_v56  ;;  %v107_v30 = vrot.slane %v1633_v20, 1  ;;  %v157_v56 = vrot.slane %v1173_v49, 4 }
  0x1c   :  { %1203 = vmatpush3.bf16.msra.mxu1 %v1318_v21  ;;  %v1635_v21 = vadd.f32 %v111_v13, %v110_v3  ;;  %v126_v17 = vadd.f32 %v125_v8, %v124_v47  ;;  %v96_v24 = vadd.f32 %v95_v28, %v1629_v18  ;;  %v1344_v18 = vld [vmem:[%s1851_s1 + $0x120] sm:$0xff]   ;;  %v1351_v8 = vld [vmem:[%s1851_s1 + $0x170] sm:$0xff]  }
  0x1d   :  { %1204 = vmatprep.subr.bf16.mxu1 %v1320_v22  ;;  %v99_v11 = vrot.slane %v98_v1, 2  ;;  %v71_v22 = vrot.slane %v70_v14, 1  ;;  %v158_v32 = vadd.f32 %v1173_v49, %v157_v56 }
  0x1e   :  { %1275 = vmatpush3.bf16.msra.mxu0 %v1319_v23  ;;  %v77_v23 = vrot.slane %v76_v15, 1  ;;  %v113_v31 = vrot.slane %v1635_v21, 1 }
  0x1f   :  { %1212 = vmatprep.subr.bf16.mxu0 %v1325_v50  ;;  %v1631_v19 = vadd.f32 %v99_v11, %v98_v1  ;;  %v1647_v34 = vadd.f32 %v71_v22, %v70_v14  ;;  %v127_v50 = vrot.slane %v1164_v43, 4  ;;  %v147_v1 = vrot.slane %v146_v62, 2  ;;  %v1340_v11 = vld [vmem:[%s1851_s1 + $0x118] sm:$0xff]  }
  0x20   :  { %1205 = vmatpush3.bf16.msra.mxu1 %v1321_v40  ;;  %v78_v35 = vadd.f32 %v77_v23, %v76_v15  ;;  %v115_v40 = vrot.slane %v1160_v41, 4  ;;  %v159_v2 = vrot.slane %v158_v32, 2 }
  0x21   :  { %1234 = vmatprep.subr.bf16.mxu1 %v1327_v4  ;;  %v101_v29 = vrot.slane %v1631_v19, 1  ;;  %v128_v59 = vadd.f32 %v1164_v43, %v127_v50  ;;  %v142_v4 = vadd.f32 %v141_v0, %v140_v61  ;;  %v148_v39 = vadd.f32 %v147_v1, %v146_v62  ;;  %v1348_v1 = vld [vmem:[%s1851_s1 + $0x128] sm:$0xff]  }
  0x22   :  { %v116_v57 = vadd.f32 %v1160_v41, %v115_v40  ;;  %v1336_v41 = vld [vmem:[%s1851_s1 + $0x110] sm:$0xff]   ;;  %v160_v5 = vadd.f32 %v159_v2, %v158_v32  ;;  %v114_v40 = vadd.f32 %v113_v31, %v1635_v21  ;;  %v163_v50 = vmul.f32 0.125, %v1647_v34 }
  0x23   :  { %829 = vmatmul.mubr.bf16.vlgmr.msra.gmra.mrb[0].mxu1 %v1322_v63  ;;  %v152_v63 = vadd.f32 %v1172_v48, %v151_v55  ;;  %v129_v43 = vrot.slane %v128_v59, 2  ;;  %v136_v48 = vadd.f32 %v135_v44, %v134_v60  ;;  %v143_v12 = vrot.slane %v142_v4, 1 }
  0x24   :  { %1235 = vmatpush3.bf16.msra.mxu1 %v1328_v9  ;;  %v117_v42 = vrot.slane %v116_v57, 2  ;;  %v149_v13 = vrot.slane %v148_v39, 1  ;;  %v161_v15 = vrot.slane %v160_v5, 1  ;;  %v102_v25 = vadd.f32 %v101_v29, %v1631_v19 }
  0x25   :  { %1236 = vmatprep.subr.bf16.mxu1 %v1331_v26  ;;  %v153_v46 = vrot.slane %v152_v63, 2  ;;  %v130_v3 = vadd.f32 %v129_v43, %v128_v59  ;;  %v137_v10 = vrot.slane %v136_v48, 1  ;;  %v108_v26 = vadd.f32 %v107_v30, %v1633_v20 }
  0x26   :  { %v118_v38 = vadd.f32 %v117_v42, %v116_v57  ;;  %v150_v45 = vadd.f32 %v149_v13, %v148_v39  ;;  %v164_v51 = vmul.f32 0.125, %v78_v35  ;;  %v162_v28 = vadd.f32 %v161_v15, %v160_v5  ;;  %v1347_v42 = vld [vmem:[%s1851_s1 + $0x168] sm:$0xff]  }
  0x27   :  { %v154_v49 = vadd.f32 %v153_v46, %v152_v63  ;;  %v131_v9 = vrot.slane %v130_v3, 1  ;;  %v138_v23 = vadd.f32 %v137_v10, %v136_v48  ;;  %v165_v20 = vmul.f32 0.125, %v1649_v36 }
  0x28   :  { %1237 = vmatpush3.bf16.msra.mxu1 %v1332_v27  ;;  %v119_v7 = vrot.slane %v118_v38, 1  ;;  %v144_v27 = vadd.f32 %v143_v12, %v142_v4  ;;  %v166_v29 = vmul.f32 0.125, %v1651_v37  ;;  %v172_v30 = vmul.f32 0.125, %v126_v17 }
  0x29   :  { %1238 = vmatprep.subr.bf16.mxu1 %v1335_v52  ;;  %v155_v14 = vrot.slane %v154_v49, 1  ;;  %v132_v22 = vadd.f32 %v131_v9, %v130_v3  ;;  %v1343_v52 = vld [vmem:[%s1851_s1 + $0x160] sm:$0xff]   ;;  %v174_v34 = vmul.f32 0.125, %v138_v23  ;;  %v167_v35 = vmul.f32 0.125, %v96_v24 }
  0x2a   :  { %v120_v16 = vadd.f32 %v119_v7, %v118_v38  ;;  %v168_v53 = vmul.f32 0.125, %v102_v25  ;;  %v169_v54 = vmul.f32 0.125, %v108_v26  ;;  %v175_v55 = vmul.f32 0.125, %v144_v27 }
  0x2b   :  { %v156_v19 = vadd.f32 %v155_v14, %v154_v49  ;;  %v173_v31 = vmul.f32 0.125, %v132_v22  ;;  %v170_v56 = vmul.f32 0.125, %v114_v40  ;;  %v176_v57 = vmul.f32 0.125, %v150_v45  ;;  %v1355_v40 = vld [vmem:[%s1851_s1 + $0x178] sm:$0xff]  }
  0x2c   :  { %1239 = vmatpush3.bf16.msra.mxu1 %v1336_v41  ;;  %v171_v21 = vmul.f32 0.125, %v120_v16  ;;  %v179_v58 = vpack.c.bf16 %v163_v50, %v163_v50  ;;  %v180_v59 = vpack.c.bf16 %v164_v51, %v164_v51  ;;  %v178_v37 = vmul.f32 0.125, %v162_v28  ;;  %v1356_v51 = vld [vmem:[%s1851_s1 + $0x138] sm:$0xff]  }
  0x2d   :  { %1240 = vmatprep.subr.bf16.mxu1 %v1339_v6  ;;  %v177_v36 = vmul.f32 0.125, %v156_v19  ;;  %v181_v60 = vpack.c.bf16 %v165_v20, %v165_v20  ;;  %v182_v61 = vpack.c.bf16 %v166_v29, %v166_v29  ;;  %v188_v63 = vpack.c.bf16 %v172_v30, %v172_v30  ;;  %v1326_v19 = vld [vmem:[%s1851_s1 + $0x80] sm:$0xff]   ;;  %v1360_v29 = vld [vmem:[%s1850_s0 + $0x10] ss:$24 sps:$4 sm:$0xff]  }
  0x2e   :  { %v187_v62 = vpack.c.bf16 %v171_v21, %v171_v21  ;;  %v189_v32 = vpack.c.bf16 %v173_v31, %v173_v31  ;;  %v190_v41 = vpack.c.bf16 %v174_v34, %v174_v34  ;;  %v183_v33 = vpack.c.bf16 %v167_v35, %v167_v35  ;;  %v1359_v31 = vld [vmem:[%s1850_s0 + $0xc] ss:$24 sps:$4 sm:$0xff]  }
  0x2f   :  { %v184_v43 = vpack.c.bf16 %v168_v53, %v168_v53  ;;  %v185_v44 = vpack.c.bf16 %v169_v54, %v169_v54  ;;  %v191_v0 = vpack.c.bf16 %v175_v55, %v175_v55  ;;  %v186_v46 = vpack.c.bf16 %v170_v56, %v170_v56  ;;  %v1362_v34 = vld [vmem:[%s1850_s0 + $0x14] ss:$24 sps:$4 sm:$0xff]  }
  0x30   :  { %1241 = vmatpush3.bf16.msra.mxu1 %v1340_v11  ;;  %v192_v2 = vpack.c.bf16 %v176_v57, %v176_v57  ;;  %v234_v38 = vunpack.c.l.b16 %v179_v58  ;;  %v235_v47 = vunpack.c.l.b16 %v180_v59  ;;  %v193_v3 = vpack.c.bf16 %v177_v36, %v177_v36  ;;  %v1352_v11 = vld [vmem:[%s1851_s1 + $0x130] sm:$0xff]  }
  0x31   :  { %1242 = vmatprep.subr.bf16.mxu1 %v1343_v52  ;;  %v194_v48 = vpack.c.bf16 %v178_v37, %v178_v37  ;;  %v236_v4 = vunpack.c.l.b16 %v181_v60  ;;  %v237_v39 = vunpack.c.l.b16 %v182_v61  ;;  %v242_v49 = vunpack.c.l.b16 %v187_v62 }
  0x32   :  { %v243_v5 = vunpack.c.l.b16 %v188_v63  ;;  %v244_v6 = vunpack.c.l.b16 %v189_v32  ;;  %v245_v7 = vunpack.c.l.b16 %v190_v41  ;;  %v238_v9 = vunpack.c.l.b16 %v183_v33 }
  0x33   :  { %v246_v10 = vunpack.c.l.b16 %v191_v0  ;;  %v239_v12 = vunpack.c.l.b16 %v184_v43  ;;  %v247_v13 = vunpack.c.l.b16 %v192_v2  ;;  %v251_v14 = vsel %vm250_vm1, %v235_v47, %v234_v38 }
  0x34   :  { %1243 = vmatpush3.bf16.msra.mxu1 %v1344_v18  ;;  %v264_v15 = vsel %vm250_vm1, %v243_v5, %v242_v49  ;;  %v240_v16 = vunpack.c.l.b16 %v185_v44  ;;  %v248_v17 = vunpack.c.l.b16 %v193_v3  ;;  %v253_v22 = vsel %vm252_vm2, %v236_v4, %v251_v14 }
  0x35   :  { %1244 = vmatprep.subr.bf16.mxu1 %v1347_v42  ;;  %v265_v23 = vsel %vm252_vm2, %v244_v6, %v264_v15  ;;  %v241_v24 = vunpack.c.l.b16 %v186_v46  ;;  %v249_v25 = vunpack.c.l.b16 %v194_v48  ;;  %v255_v26 = vsel %vm254_vm3, %v237_v39, %v253_v22 }
  0x36   :  { %v266_v27 = vsel %vm254_vm3, %v245_v7, %v265_v23  ;;  %v257_v45 = vsel %vm256_vm4, %v238_v9, %v255_v26 }
  0x37   :  { %v267_v50 = vsel %vm256_vm4, %v246_v10, %v266_v27  ;;  %v259_v52 = vsel %vm258_vm5, %v239_v12, %v257_v45 }
  0x38   :  { %1245 = vmatpush3.bf16.msra.mxu1 %v1348_v1  ;;  %v268_v18 = vsel %vm258_vm5, %v247_v13, %v267_v50  ;;  %v261_v28 = vsel %vm260_vm6, %v240_v16, %v259_v52 }
  0x39   :  { %1246 = vmatprep.subr.bf16.mxu1 %v1351_v8  ;;  %v269_v20 = vsel %vm260_vm6, %v248_v17, %v268_v18  ;;  %v263_v21 = vsel %vm262_vm7, %v241_v24, %v261_v28 }
  0x3a   :  { %v270_v30 = vsel %vm262_vm7, %v249_v25, %v269_v20 }
  0x3c   :  { %1247 = vmatpush3.bf16.msra.mxu1 %v1352_v11 }
  0x3d   :  { %1248 = vmatprep.subr.bf16.mxu1 %v1355_v40 }
  0x40   :  { %1249 = vmatpush3.bf16.msra.mxu1 %v1356_v51 }
  0x41   :  { %15 = vsyncpa [#allocation7], 0  ;;  %v271_v35 = vpack.c.b16 %v270_v30, %v263_v21  ;;  %v1329_v53 = vld [vmem:[%s1851_s1 + $0xc8] sm:$0xff]   ;;  %910 = vmatprep.mubr.bf16.mxu1 %v1362_v34  ;;  %v1333_v55 = vld [vmem:[%s1851_s1 + $0xd0] sm:$0xff]   ;;  %s1444_s29 = smov [#allocation4]  }
  0x42   :  { %v1330_v54 = vld [vmem:[%s1851_s1 + $0x88] sm:$0xff]   ;;  %v1334_v56 = vld [vmem:[%s1851_s1 + $0x90] sm:$0xff]   ;;  %v1337_v57 = vld [vmem:[%s1851_s1 + $0xd8] sm:$0xff]   ;;  %s1036_s30 = sshll.u32 %s1444_s29, 4  ;;  %s1037_s30 = int_to_ptr.vmem [resolvable:$true] %s1036_s30 }
  0x43   :  { %1277 = vmatmul.mubr.bf16.vlgmr.msra.gmra.mrb[0].mxu0 %v271_v35  ;;  %911 = vmatmul.mubr.bf16.vlgmr.msra.gmra.mrb[4].mxu1 %v1360_v29  ;;  %v1338_v58 = vld [vmem:[%s1851_s1 + $0x98] sm:$0xff]   ;;  %v1341_v59 = vld [vmem:[%s1851_s1 + $0xe0] sm:$0xff]   ;;  %v1345_v37 = vld [vmem:[%s1851_s1 + $0xe8] sm:$0xff]  }
  0x44   :  { %1213 = vmatpush3.bf16.msra.mxu0 %v1326_v19  ;;  %869 = vmatprep.mubr.bf16.mxu0 %v1359_v31  ;;  %v1342_v36 = vld [vmem:[%s1851_s1 + $0xa0] sm:$0xff]   ;;  %v1346_v60 = vld [vmem:[%s1851_s1 + $0xa8] sm:$0xff]   ;;  %v1349_v61 = vld [vmem:[%s1851_s1 + $0xf0] sm:$0xff]  }
  0x45   :  { %1214 = vmatprep.subr.bf16.mxu0 %v1329_v53  ;;  %v1350_v62 = vld [vmem:[%s1851_s1 + $0xb0] sm:$0xff]   ;;  %v1353_v63 = vld [vmem:[%s1851_s1 + $0xf8] sm:$0xff]   ;;  %v1357_v41 = vld [vmem:[%s1850_s0 + $0x8] ss:$24 sps:$4 sm:$0xff]  }
  0x46   :  { %v1354_v32 = vld [vmem:[%s1851_s1 + $0xb8] sm:$0xff]   ;;  %v1078_v46 = vld [vmem:[%s1855_s5] ss:$0 sm:$0xff] }
  0x47   :  { %v1141_v22 = vld [vmem:[%s1852_s2] ss:$0 sm:$0xff]  ;;  %s1443_s2 = smov [#allocation6]  }
  0x48   :  { %1215 = vmatpush3.bf16.msra.mxu0 %v1330_v54  ;;  %s1048_s5 = sshll.u32 %s1443_s2, 4  ;;  %s1049_s5 = int_to_ptr.vmem [resolvable:$true] %s1048_s5 }
  0x49   :  { %1216 = vmatprep.subr.bf16.mxu0 %v1333_v55  ;;  %s1371_s9 = scalar_lea.vmem %s1049_s5, 256  ;;  %p1376_p1 = scmp.lt.s32.totalorder %s1049_s5, %s1049_s5 }
  0x4a   :  { %p1372_p0 = scmp.ne.s32.totalorder %s1049_s5, %s1371_s9  ;;  %p1377_p2 = scmp.lt.s32.totalorder %s1371_s9, %s1371_s9 }
  0x4c   :  { %1217 = vmatpush3.bf16.msra.mxu0 %v1334_v56  ;;  %p1378_p3 = por %p1377_p2, %p1376_p1 }
  0x4d   :  { %1218 = vmatprep.subr.bf16.mxu0 %v1337_v57 }
  0x4e   :  { %p1379_p4 = pnand %p1378_p3, %p1372_p0 }
  0x50   :  { %1219 = vmatpush3.bf16.msra.mxu0 %v1338_v58 }
  0x51   :  { %1220 = vmatprep.subr.bf16.mxu0 %v1341_v59 }
  0x54   :  { %1221 = vmatpush3.bf16.msra.mxu0 %v1342_v36 }
  0x55   :  { %1222 = vmatprep.subr.bf16.mxu0 %v1345_v37 }
  0x58   :  { %1223 = vmatpush3.bf16.msra.mxu0 %v1346_v60 }
  0x59   :  { %1224 = vmatprep.subr.bf16.mxu0 %v1349_v61 }
  0x5c   :  { %1225 = vmatpush3.bf16.msra.mxu0 %v1350_v62 }
  0x5d   :  { %1226 = vmatprep.subr.bf16.mxu0 %v1353_v63 }
  0x60   :  { %1227 = vmatpush3.bf16.msra.mxu0 %v1354_v32 }
  0x63   :  { %870 = vmatmul.mubr.bf16.vlgmr.msra.gmra.mrb[4].mxu0 %v1357_v41 }
  0xf6   :  { %v1206_v42 = vpop.f32.mrb[0].mxu1 }
  0xf7   :  { %v1207_v33 = vpop.f32.mrb[1].mxu1 }
  0xf8   :  { %v1208_v43 = vadd.f32 %v1207_v33, %v1206_v42  ;;  %v1209_v44 = vpop.f32.mrb[2].mxu1 }
  0xf9   :  { %v1210_v0 = vpop.f32.mrb[3].mxu1 }
  0xfa   :  { %v1211_v1 = vadd.f32 %v1210_v0, %v1209_v44 }
 0x116   :  { %v355_v2 = vpop.f32.mrb[0].mxu0  ;;  %v1250_v38 = vpop.f32.mrb[4].mxu1 }
 0x117   :  { %v356_v47 = vadd.f32 %v1078_v46, %v355_v2  ;;  %v1278_v3 = vpop.f32.mrb[1].mxu0  ;;  %v1251_v48 = vpop.f32.mrb[5].mxu1 }
 0x118   :  { %v358_v4 = vpop.f32.mrb[2].mxu0  ;;  %v1252_v39 = vadd.f32 %v1251_v48, %v1250_v38  ;;  %v1253_v49 = vpop.f32.mrb[6].mxu1 }
 0x119   :  { %v359_v5 = vadd.f32 %v1078_v46, %v358_v4  ;;  %v1279_v6 = vpop.f32.mrb[3].mxu0  ;;  %v362_v7 = vmul.f32 %v356_v47, %v356_v47  ;;  %v1254_v8 = vpop.f32.mrb[7].mxu1 }
 0x11a   :  { %v1255_v9 = vadd.f32 %v1254_v8, %v1253_v49 }
 0x11b   :  { %364 = vadd.xlane.f32.xlu0 %v362_v7  ;;  %v363_v10 = vmul.f32 %v359_v5, %v359_v5 }
 0x11f   :  { %366 = vadd.xlane.f32.xlu0 %v363_v10 }
 0x136   :  { %v1228_v11 = vpop.f32.mrb[4].mxu0 }
 0x137   :  { %v1229_v12 = vpop.f32.mrb[5].mxu0 }
 0x138   :  { %v1230_v13 = vadd.f32 %v1229_v12, %v1228_v11  ;;  %v1231_v14 = vpop.f32.mrb[6].mxu0 }
 0x139   :  { %v1232_v15 = vpop.f32.mrb[7].mxu0 }
 0x13a   :  { %v872_v16 = vadd.f32 %v1230_v13, %v1208_v43  ;;  %v1233_v17 = vadd.f32 %v1232_v15, %v1231_v14 }
 0x13c   :  { %v913_v23 = vadd.f32 %v1252_v39, %v872_v16  ;;  %v875_v24 = vadd.f32 %v1233_v17, %v1211_v1 }
 0x13e   :  { %v916_v25 = vadd.f32 %v1255_v9, %v875_v24  ;;  %v935_v26 = vadd.f32 %v1141_v22, %v913_v23 }
 0x140   :  { %v937_v27 = vmul.f32 %v935_v26, %v935_v26  ;;  %v936_v40 = vadd.f32 %v1141_v22, %v916_v25 }
 0x142   :  { %939 = vadd.xlane.f32.xlu1 %v937_v27  ;;  %v938_v45 = vmul.f32 %v936_v40, %v936_v40 }
 0x146   :  { %941 = vadd.xlane.f32.xlu1 %v938_v45 }
 0x1a8   :  { %v365_v50 = vpop.xlane.xlu0 %364 }
 0x1a9   :  { %1363 = vrsqrt.f32 %v365_v50 }
 0x1ac   :  { %v367_v51 = vpop.xlane.xlu0 %366 }
 0x1ad   :  { %1365 = vrsqrt.f32 %v367_v51 }
 0x1b3   :  { %v1364_v52 = vpop.eup %1363 }
 0x1b4   :  { %v370_v18 = vmul.f32 %v1364_v52, %v356_v47 }
 0x1b6   :  { %951 = vst [vmem:[#allocation6] sm:$0xff] %v370_v18 }
 0x1b7   :  { %v1366_v19 = vpop.eup %1365 }
 0x1b8   :  { %v371_v28 = vmul.f32 %v1366_v19, %v359_v5 }
 0x1ba   :  { %952 = vst [vmem:[#allocation6 + $0x8] sm:$0xff] %v371_v28  ;;  %v1287_v20 = vpack.c.bf16 %v371_v28, %v370_v18 }
 0x1bc   :  { %1288 = vmatprep.subr.bf16.mxu0 %v1287_v20 }
 0x1bd   :  { %1290 = vmatpush3.bf16.xpose.msra.mxu0 %v1287_v20 }
 0x1cf   :  { %v940_v29 = vpop.xlane.xlu1 %939 }
 0x1d0   :  { %1367 = vrsqrt.f32 %v940_v29 }
 0x1d3   :  { %v942_v21 = vpop.xlane.xlu1 %941 }
 0x1d4   :  { %1369 = vrsqrt.f32 %v942_v21 }
 0x1da   :  { %v1368_v30 = vpop.eup %1367 }
 0x1db   :  { %v945_v31 = vmul.f32 %v1368_v30, %v935_v26 }
 0x1dd   :  { %1284 = vmatprep.mubr.f32.mxu0 %v945_v31  ;;  %949 = vst [vmem:[#allocation4] sm:$0xff] %v945_v31 }
 0x1de   :  { %v1370_v34 = vpop.eup %1369 }
 0x1df   :  { %v946_v35 = vmul.f32 %v1370_v34, %v936_v40 }
 0x1e1   :  { %1285 = vmatmul.mubr.f32.vlgmr.msra.gmra.mrb[8].mxu0 %v946_v35  ;;  %950 = vst [vmem:[#allocation4 + $0x8] sm:$0xff] %v946_v35 }
 0x1e2   :  { %1382 = shalt.err (!%p1379_p4)
}
 0x1e3   :  { %s1383_s12 = scalar_lea.hbm %s1857_s7, 256 }
 0x1e4   :  { %p1384_p5 = scmp.ne.s32.totalorder %s1857_s7, %s1383_s12  ;;  %p1387_p6 = scmp.lt.u32.totalorder %s1383_s12, %s1857_s7 }
 0x1e6   :  { %p1389_p7 = pnand %p1387_p6, %p1384_p5 }
 0x1e8   :  { %1392 = shalt.err (!%p1389_p7)
}
 0x1e9   :  { %s1445_s16 = smov 128   ;;  %s1446_s17 = smov 8  }
 0x1ea   :  { %1054 = dma.vmem_to_hbm [thread:$0]  %s1049_s5, 256, %s1857_s7, [#allocation7], %s1445_s16, %s1445_s16, %s1446_s17  }
 0x1eb   :  { %s1393_s20 = scalar_lea.vmem %s1037_s30, 256  ;;  %p1398_p9 = scmp.lt.s32.totalorder %s1037_s30, %s1037_s30 }
 0x1ec   :  { %p1394_p8 = scmp.ne.s32.totalorder %s1037_s30, %s1393_s20  ;;  %p1399_p10 = scmp.lt.s32.totalorder %s1393_s20, %s1393_s20 }
 0x1ee   :  { %p1400_p11 = por %p1399_p10, %p1398_p9 }
 0x1f0   :  { %p1401_p12 = pnand %p1400_p11, %p1394_p8 }
 0x1f2   :  { %1404 = shalt.err (!%p1401_p12)
}
 0x1f3   :  { %s1405_s23 = scalar_lea.hbm %s1856_s6, 256 }
 0x1f4   :  { %p1406_p13 = scmp.ne.s32.totalorder %s1856_s6, %s1405_s23  ;;  %p1409_p0 = scmp.lt.u32.totalorder %s1405_s23, %s1856_s6 }
 0x1f6   :  { %p1411_p1 = pnand %p1409_p0, %p1406_p13 }
 0x1f8   :  { %1414 = shalt.err (!%p1411_p1)
}
 0x1f9   :  { %1042 = dma.vmem_to_hbm [thread:$0]  %s1037_s30, 256, %s1856_s6, [#allocation5], %s1445_s16, %s1445_s16, %s1446_s17   ;;  %vm1028_vm8 = vcmask 130048  }
 0x1fa   :  { %s1447_s28 = smov [#allocation8]  }
 0x1fb   :  { %s1060_s0 = sshll.u32 %s1447_s28, 4  ;;  %s1061_s0 = int_to_ptr.vmem [resolvable:$true] %s1060_s0 }
 0x1fc   :  { %s1415_s1 = scalar_lea.vmem %s1061_s0, 256  ;;  %p1420_p3 = scmp.lt.s32.totalorder %s1061_s0, %s1061_s0 }
 0x1fd   :  { %p1416_p2 = scmp.ne.s32.totalorder %s1061_s0, %s1415_s1  ;;  %p1421_p4 = scmp.lt.s32.totalorder %s1415_s1, %s1415_s1 }
 0x1ff   :  { %p1422_p5 = por %p1421_p4, %p1420_p3 }
 0x201   :  { %p1423_p6 = pnand %p1422_p5, %p1416_p2 }
 0x2b4   :  { %v1286_v53 = vpop.f32.mrb[8].mxu0 }
 0x2b5   :  { %1030 = vst.msk [vmem:[#allocation8 + $0x8] sm:$0xff] %vm1028_vm8, %v1286_v53  ;;  %v1019_v54 = vpop.f32.mrb[9].mxu0 }
 0x2b6   :  { %1029 = vst.msk [vmem:[#allocation8] sm:$0xff] %vm1028_vm8, %v1019_v54 }
 0x2b7   :  { %1426 = shalt.err (!%p1423_p6)
}
 0x2b8   :  { %s1427_s29 = scalar_lea.hbm %s1858_s8, 256 }
 0x2b9   :  { %p1428_p7 = scmp.ne.s32.totalorder %s1858_s8, %s1427_s29  ;;  %p1431_p8 = scmp.lt.u32.totalorder %s1427_s29, %s1858_s8 }
 0x2bb   :  { %p1433_p9 = pnand %p1431_p8, %p1428_p7 }
 0x2bd   :  { %1436 = shalt.err (!%p1433_p9)
}
 0x2be   :  { %1066 = dma.vmem_to_hbm [thread:$0]  %s1061_s0, 256, %s1858_s8, [#allocation7], %s1445_s16, %s1445_s16, %s1446_s17  }
 0x2bf   :  { %1437 = dma.done.wait [#allocation5], 256  }
 0x2c0   :  { %1438 = vsyncadd [#allocation5], 4294967040 }
 0x2c1   :  { %1439 = dma.done.wait [#allocation7], 512  }
 0x2c2   :  { %1440 = vsyncadd [#allocation7], 4294966784 }
 0x2c3   :  { %1076 = vsyncpa [#allocation5], 1 }
 0x2c4   :  { %1077 = vsyncpa [#allocation7], 1 }

</bundles_post_ra>
